<compile_context>
chip_gen: v7x
topology: tpu7x:2x2x1
jax: 0.10.0
libtpu: 0.0.40
codegen_flags: <defaults>
</compile_context>

<pallas_src>
import functools

import jax
import jax.numpy as jnp
from jax.experimental import pallas as pl
from jax.experimental.pallas import tpu as pltpu

BN_EPS = 1e-5


def _fused_conv_bn_relu_kernel(lhs_ref, w_ref, sel_ref, selt_ref,
                               gamma_ref, beta_ref, o_ref, *, inv_count, eps):
    """One grid step: conv (single MXU matmul) + exact BN stats + affine + ReLU.

    lhs_ref   : (N*H, CKWp_pad) bf16   height-im2col'd padded input rows
    w_ref     : (CKWp_pad, O*W) bf16   Toeplitz-expanded weights, lanes = o*W+w
    sel_ref   : (O*W, O) f32           lane -> channel selector (sum over w)
    selt_ref  : (O, O*W) f32           channel -> lane broadcaster
    gamma_ref : (1, O) f32
    beta_ref  : (1, O) f32
    o_ref     : (N*H, O*W) f32         normalized + ReLU'd conv output
    """
    # Conv for the whole batch as one matmul; f32 accumulation.
    y = jnp.dot(lhs_ref[...], w_ref[...],
                preferred_element_type=jnp.float32)            # (NH, OW)

    # Per-channel mean (exact, f32): sum over rows, then over the w lanes of
    # each channel via a tiny selector matmul (keeps everything lane-aligned).
    colsum = jnp.sum(y, axis=0, keepdims=True)                 # (1, OW)
    mean = jnp.dot(colsum, sel_ref[...],
                   preferred_element_type=jnp.float32) * inv_count   # (1, O)
    mean_b = jnp.dot(mean, selt_ref[...],
                     preferred_element_type=jnp.float32)       # (1, OW)

    # Centered variance (no E[x^2]-E[x]^2 cancellation).
    centered = y - mean_b                                      # (NH, OW)
    sq_colsum = jnp.sum(centered * centered, axis=0, keepdims=True)  # (1, OW)
    var = jnp.dot(sq_colsum, sel_ref[...],
                  preferred_element_type=jnp.float32) * inv_count    # (1, O)
    inv_std = jax.lax.rsqrt(var + eps)                         # (1, O)

    # Folded affine: out = centered * (gamma*inv_std) + beta, then ReLU.
    scale = gamma_ref[...] * inv_std                           # (1, O)
    scale_b = jnp.dot(scale, selt_ref[...],
                      preferred_element_type=jnp.float32)      # (1, OW)
    shift_b = jnp.dot(beta_ref[...], selt_ref[...],
                      preferred_element_type=jnp.float32)      # (1, OW)
    out = centered * scale_b + shift_b
    o_ref[...] = jnp.maximum(out, 0.0).astype(o_ref.dtype)


@functools.partial(jax.jit, static_argnames=("kernel_size",))
def conv_layer_forward(x, weight, bias, gamma, beta, kernel_size=5):
    """x: (N, C, H, W) f32.  weight: (O, C, K, K).  Returns (N, O, H, W) f32.

    `bias` is intentionally unused: train-mode BatchNorm subtracts the batch
    mean immediately after the conv, which cancels a per-channel bias exactly.
    """
    if kernel_size == 5:
        padding = 2
    elif kernel_size == 7:
        padding = 3
    else:
        raise ValueError("kernel_size must be 5 or 7")

    N, C, H, W = x.shape
    O = weight.shape[0]
    K = kernel_size
    Hp, Wp = H + 2 * padding, W + 2 * padding
    OW = O * W
    CKWp = C * K * Wp
    CKWp_pad = max(128, ((CKWp + 127) // 128) * 128)   # lane-align contraction

    # --- Host-side height-only im2col (Kx blow-up only) -> LHS bf16 ---
    xp = jnp.pad(x, ((0, 0), (0, 0), (padding, padding), (padding, padding)))
    h_idx = jnp.arange(H)[:, None] + jnp.arange(K)[None, :]        # (H, K)
    lhs = jnp.take(xp, h_idx.reshape(-1), axis=2)                  # (N,C,H*K,Wp)
    lhs = lhs.reshape(N, C, H, K, Wp)
    lhs = jnp.transpose(lhs, (0, 2, 1, 3, 4))                      # (N,H,C,K,Wp)
    lhs = lhs.reshape(N * H, CKWp)
    lhs = jnp.pad(lhs, ((0, 0), (0, CKWp_pad - CKWp))).astype(jnp.bfloat16)

    # --- Toeplitz-expanded weights, rows (c,ky,wx), lanes o*W + w ---
    #   B[(c*K+ky)*Wp + wx, o*W + w] = weight[o, c, ky, wx - w] if 0<=wx-w<K else 0
    wt = jnp.transpose(weight, (1, 2, 3, 0))                       # (C,K,K,O)
    kx = jnp.arange(Wp)[:, None] - jnp.arange(W)[None, :]          # (Wp, W)
    valid = (kx >= 0) & (kx < K)
    kx_c = jnp.clip(kx, 0, K - 1)
    B = wt[:, :, kx_c, :]                                          # (C,K,Wp,W,O)
    B = jnp.where(valid[None, None, :, :, None], B, 0.0)
    B = jnp.transpose(B, (0, 1, 2, 4, 3))                          # (C,K,Wp,O,W)
    B = B.reshape(CKWp, OW)
    B = jnp.pad(B, ((0, CKWp_pad - CKWp), (0, 0))).astype(jnp.bfloat16)

    # Lane <-> channel selectors (0/1 matrices, f32).
    sel = jnp.repeat(jnp.eye(O, dtype=jnp.float32), W, axis=0)     # (O*W, O)
    selt = sel.T                                                   # (O, O*W)

    gamma_row = gamma.astype(jnp.float32).reshape(1, O)
    beta_row = beta.astype(jnp.float32).reshape(1, O)

    # Tight VMEM budget computed from the actual buffers (x2 for buffering).
    in_bytes = (N * H * CKWp_pad * 2 + CKWp_pad * OW * 2
                + OW * O * 4 + O * OW * 4 + 2 * O * 4)
    out_bytes = N * H * OW * 4
    vmem_limit = max(4 << 20, 2 * (in_bytes + out_bytes) + (1 << 20))

    inv_count = 1.0 / float(N * H * W)

    out_flat = pl.pallas_call(
        functools.partial(_fused_conv_bn_relu_kernel,
                          inv_count=inv_count, eps=BN_EPS),
        out_shape=jax.ShapeDtypeStruct((N * H, OW), jnp.float32),
        grid=(1,),
        in_specs=[
            pl.BlockSpec((N * H, CKWp_pad), lambda i: (0, 0)),
            pl.BlockSpec((CKWp_pad, OW), lambda i: (0, 0)),
            pl.BlockSpec((OW, O), lambda i: (0, 0)),
            pl.BlockSpec((O, OW), lambda i: (0, 0)),
            pl.BlockSpec((1, O), lambda i: (0, 0)),
            pl.BlockSpec((1, O), lambda i: (0, 0)),
        ],
        out_specs=pl.BlockSpec((N * H, OW), lambda i: (0, 0)),
        compiler_params=pltpu.CompilerParams(
            dimension_semantics=("arbitrary",),
            vmem_limit_bytes=int(vmem_limit)),
    )(lhs, B, sel, selt, gamma_row, beta_row)

    # (N*H, O*W) with lanes o*W+w  ->  (N, H, O, W)  ->  (N, O, H, W).
    # The permute swaps H and O only; the minor dim W is untouched (cheap).
    return jnp.transpose(out_flat.reshape(N, H, O, W), (0, 2, 1, 3))


def _reference(x, weight, bias, gamma, beta, kernel_size=5):
    """Pure-JAX reference (conv + train-mode BN + ReLU), NCHW, f32."""
    padding = 2 if kernel_size == 5 else 3
    y = jax.lax.conv_general_dilated(
        x, weight, window_strides=(1, 1),
        padding=[(padding, padding), (padding, padding)],
        dimension_numbers=("NCHW", "OIHW", "NCHW"),
        precision=jax.lax.Precision.HIGHEST)
    y = y + bias[None, :, None, None]
    mean = jnp.mean(y, axis=(0, 2, 3), keepdims=True)
    var = jnp.mean((y - mean) ** 2, axis=(0, 2, 3), keepdims=True)
    y = (y - mean) * jax.lax.rsqrt(var + BN_EPS)
    y = y * gamma[None, :, None, None] + beta[None, :, None, None]
    return jnp.maximum(y, 0.0)


def _run_case(key, N, C, H, W, O, K):
    kx_, kw_, kb_ = jax.random.split(key, 3)
    x = jax.random.normal(kx_, (N, C, H, W), dtype=jnp.float32)
    fan_in = C * K * K
    bound = 1.0 / (fan_in ** 0.5)
    weight = jax.random.uniform(kw_, (O, C, K, K), jnp.float32, -bound, bound)
    bias = jax.random.uniform(kb_, (O,), jnp.float32, -bound, bound)
    gamma = jnp.ones((O,), jnp.float32)   # BatchNorm2d default weight
    beta = jnp.zeros((O,), jnp.float32)   # BatchNorm2d default bias

    out = conv_layer_forward(x, weight, bias, gamma, beta, kernel_size=K)
    out = jax.block_until_ready(out)
    assert out.shape == (N, O, H, W)

    # Loose check vs. the all-f32 reference (kernel matmul operands are bf16).
    ref = _reference(x, weight, bias, gamma, beta, kernel_size=K)
    assert jnp.allclose(out, ref, rtol=5e-2, atol=5e-2), "mismatch vs f32 ref"

    # Tight check vs. a reference whose conv inputs are bf16-rounded (same
    # operand precision as the kernel; all accumulation f32 in both).
    x_b = x.astype(jnp.bfloat16).astype(jnp.float32)
    w_b = weight.astype(jnp.bfloat16).astype(jnp.float32)
    ref_b = _reference(x_b, w_b, bias, gamma, beta, kernel_size=K)
    assert jnp.allclose(out, ref_b, rtol=2e-3, atol=2e-4), \
        "mismatch vs bf16-rounded reference"


if __name__ == "__main__":
    key = jax.random.PRNGKey(0)
    k0, k1 = jax.random.split(key)
    # ConvLayer(in_channels=1, out_channels=16, kernel_size=5, last=nn.ReLU)
    _run_case(k0, N=2, C=1, H=16, W=16, O=16, K=5)
    # Multi-channel sanity check (exercises the folded c/ky/wx contraction).
    _run_case(k1, N=2, C=4, H=16, W=16, O=16, K=5)
    print("KERNEL_OK")
</pallas_src>

<mosaic_0001>
module attributes {stable_mosaic.version = 11 : i64} {
  func.func @_fused_conv_bn_relu_kernel(%arg0: i32, %arg1: memref<32x128xbf16, #tpu.memory_space<vmem>>, %arg2: memref<128x256xbf16, #tpu.memory_space<vmem>>, %arg3: memref<256x16xf32, #tpu.memory_space<vmem>>, %arg4: memref<16x256xf32, #tpu.memory_space<vmem>>, %arg5: memref<1x16xf32, #tpu.memory_space<vmem>>, %arg6: memref<1x16xf32, #tpu.memory_space<vmem>>, %arg7: memref<32x256xf32, #tpu.memory_space<vmem>>) attributes {dimension_semantics = [#tpu.dimension_semantics<arbitrary>], iteration_bounds = array<i64: 1>, scalar_prefetch = 0 : i64, scratch_operands = 0 : i64, tpu.core_type = #tpu.core_type<tc>, window_params = [{pipeline_mode = #tpu.pipeline_mode<synchronous>, transform_indices = @transform_0, window_bounds = array<i64: 32, 128>}, {pipeline_mode = #tpu.pipeline_mode<synchronous>, transform_indices = @transform_1, window_bounds = array<i64: 128, 256>}, {pipeline_mode = #tpu.pipeline_mode<synchronous>, transform_indices = @transform_2, window_bounds = array<i64: 256, 16>}, {pipeline_mode = #tpu.pipeline_mode<synchronous>, transform_indices = @transform_3, window_bounds = array<i64: 16, 256>}, {pipeline_mode = #tpu.pipeline_mode<synchronous>, transform_indices = @transform_4, window_bounds = array<i64: 1, 16>}, {pipeline_mode = #tpu.pipeline_mode<synchronous>, transform_indices = @transform_5, window_bounds = array<i64: 1, 16>}, {pipeline_mode = #tpu.pipeline_mode<synchronous>, transform_indices = @transform_6, window_bounds = array<i64: 32, 256>}]} {
    %c0 = arith.constant 0 : index
    %c0_0 = arith.constant 0 : index
    %0 = vector.load %arg1[%c0, %c0_0] : memref<32x128xbf16, #tpu.memory_space<vmem>>, vector<32x128xbf16>
    %c0_1 = arith.constant 0 : index
    %c0_2 = arith.constant 0 : index
    %1 = vector.load %arg2[%c0_1, %c0_2] : memref<128x256xbf16, #tpu.memory_space<vmem>>, vector<128x256xbf16>
    %cst = arith.constant dense<0.000000e+00> : vector<32x256xf32>
    %2 = tpu.matmul %0, %1, %cst {dimension_numbers = #tpu.dot_dimension_numbers<[1], [0], [0], [1], [0, 0, 1, 1], [], []>} : vector<32x128xbf16>, vector<128x256xbf16>, vector<32x256xf32> -> vector<32x256xf32>
    %cst_3 = arith.constant dense<0.000000e+00> : vector<256xf32>
    %3 = vector.multi_reduction <add>, %2, %cst_3 [0] : vector<32x256xf32> to vector<256xf32>
    %4 = vector.shape_cast %3 : vector<256xf32> to vector<1x256xf32>
    %c0_4 = arith.constant 0 : index
    %c0_5 = arith.constant 0 : index
    %5 = vector.load %arg3[%c0_4, %c0_5] : memref<256x16xf32, #tpu.memory_space<vmem>>, vector<256x16xf32>
    %cst_6 = arith.constant dense<0.000000e+00> : vector<1x16xf32>
    %6 = tpu.matmul %4, %5, %cst_6 {dimension_numbers = #tpu.dot_dimension_numbers<[1], [0], [0], [1], [0, 0, 1, 1], [], []>} : vector<1x256xf32>, vector<256x16xf32>, vector<1x16xf32> -> vector<1x16xf32>
    %cst_7 = arith.constant 0.001953125 : f32
    %7 = vector.broadcast %cst_7 : f32 to vector<1x16xf32>
    %8 = arith.mulf %6, %7 : vector<1x16xf32>
    %c0_8 = arith.constant 0 : index
    %c0_9 = arith.constant 0 : index
    %9 = vector.load %arg4[%c0_8, %c0_9] : memref<16x256xf32, #tpu.memory_space<vmem>>, vector<16x256xf32>
    %cst_10 = arith.constant dense<0.000000e+00> : vector<1x256xf32>
    %10 = tpu.matmul %8, %9, %cst_10 {dimension_numbers = #tpu.dot_dimension_numbers<[1], [0], [0], [1], [0, 0, 1, 1], [], []>} : vector<1x16xf32>, vector<16x256xf32>, vector<1x256xf32> -> vector<1x256xf32>
    %11 = vector.broadcast %10 : vector<1x256xf32> to vector<32x256xf32>
    %12 = arith.subf %2, %11 : vector<32x256xf32>
    %13 = arith.mulf %12, %12 : vector<32x256xf32>
    %cst_11 = arith.constant dense<0.000000e+00> : vector<256xf32>
    %14 = vector.multi_reduction <add>, %13, %cst_11 [0] : vector<32x256xf32> to vector<256xf32>
    %15 = vector.shape_cast %14 : vector<256xf32> to vector<1x256xf32>
    %c0_12 = arith.constant 0 : index
    %c0_13 = arith.constant 0 : index
    %16 = vector.load %arg3[%c0_12, %c0_13] : memref<256x16xf32, #tpu.memory_space<vmem>>, vector<256x16xf32>
    %cst_14 = arith.constant dense<0.000000e+00> : vector<1x16xf32>
    %17 = tpu.matmul %15, %16, %cst_14 {dimension_numbers = #tpu.dot_dimension_numbers<[1], [0], [0], [1], [0, 0, 1, 1], [], []>} : vector<1x256xf32>, vector<256x16xf32>, vector<1x16xf32> -> vector<1x16xf32>
    %cst_15 = arith.constant 0.001953125 : f32
    %18 = vector.broadcast %cst_15 : f32 to vector<1x16xf32>
    %19 = arith.mulf %17, %18 : vector<1x16xf32>
    %cst_16 = arith.constant 9.99999974E-6 : f32
    %20 = vector.broadcast %cst_16 : f32 to vector<1x16xf32>
    %21 = arith.addf %19, %20 : vector<1x16xf32>
    %22 = math.rsqrt %21 : vector<1x16xf32>
    %c0_17 = arith.constant 0 : index
    %c0_18 = arith.constant 0 : index
    %23 = vector.load %arg5[%c0_17, %c0_18] : memref<1x16xf32, #tpu.memory_space<vmem>>, vector<1x16xf32>
    %24 = arith.mulf %23, %22 : vector<1x16xf32>
    %c0_19 = arith.constant 0 : index
    %c0_20 = arith.constant 0 : index
    %25 = vector.load %arg4[%c0_19, %c0_20] : memref<16x256xf32, #tpu.memory_space<vmem>>, vector<16x256xf32>
    %cst_21 = arith.constant dense<0.000000e+00> : vector<1x256xf32>
    %26 = tpu.matmul %24, %25, %cst_21 {dimension_numbers = #tpu.dot_dimension_numbers<[1], [0], [0], [1], [0, 0, 1, 1], [], []>} : vector<1x16xf32>, vector<16x256xf32>, vector<1x256xf32> -> vector<1x256xf32>
    %c0_22 = arith.constant 0 : index
    %c0_23 = arith.constant 0 : index
    %27 = vector.load %arg6[%c0_22, %c0_23] : memref<1x16xf32, #tpu.memory_space<vmem>>, vector<1x16xf32>
    %c0_24 = arith.constant 0 : index
    %c0_25 = arith.constant 0 : index
    %28 = vector.load %arg4[%c0_24, %c0_25] : memref<16x256xf32, #tpu.memory_space<vmem>>, vector<16x256xf32>
    %cst_26 = arith.constant dense<0.000000e+00> : vector<1x256xf32>
    %29 = tpu.matmul %27, %28, %cst_26 {dimension_numbers = #tpu.dot_dimension_numbers<[1], [0], [0], [1], [0, 0, 1, 1], [], []>} : vector<1x16xf32>, vector<16x256xf32>, vector<1x256xf32> -> vector<1x256xf32>
    %30 = vector.broadcast %26 : vector<1x256xf32> to vector<32x256xf32>
    %31 = arith.mulf %12, %30 : vector<32x256xf32>
    %32 = vector.broadcast %29 : vector<1x256xf32> to vector<32x256xf32>
    %33 = arith.addf %31, %32 : vector<32x256xf32>
    %cst_27 = arith.constant 0.000000e+00 : f32
    %34 = vector.broadcast %cst_27 : f32 to vector<32x256xf32>
    %35 = arith.maximumf %33, %34 : vector<32x256xf32>
    %c0_28 = arith.constant 0 : index
    %c0_29 = arith.constant 0 : index
    %36 = vector.load %arg7[%c0_28, %c0_29] : memref<32x256xf32, #tpu.memory_space<vmem>>, vector<32x256xf32>
    tpu.vector_store %arg7[%c0_28, %c0_29], %35 {strides = array<i32>} : memref<32x256xf32, #tpu.memory_space<vmem>>, vector<32x256xf32>,
    return
  }
  func.func @transform_0(%arg0: i32) -> (i32, i32) {
    %c0_i32 = arith.constant 0 : i32
    %c0_i32_0 = arith.constant 0 : i32
    %c0_i32_1 = arith.constant 0 : i32
    return %c0_i32, %c0_i32_0 : i32, i32
  }
  func.func @transform_1(%arg0: i32) -> (i32, i32) {
    %c0_i32 = arith.constant 0 : i32
    %c0_i32_0 = arith.constant 0 : i32
    %c0_i32_1 = arith.constant 0 : i32
    return %c0_i32, %c0_i32_0 : i32, i32
  }
  func.func @transform_2(%arg0: i32) -> (i32, i32) {
    %c0_i32 = arith.constant 0 : i32
    %c0_i32_0 = arith.constant 0 : i32
    %c0_i32_1 = arith.constant 0 : i32
    return %c0_i32, %c0_i32_0 : i32, i32
  }
  func.func @transform_3(%arg0: i32) -> (i32, i32) {
    %c0_i32 = arith.constant 0 : i32
    %c0_i32_0 = arith.constant 0 : i32
    %c0_i32_1 = arith.constant 0 : i32
    return %c0_i32, %c0_i32_0 : i32, i32
  }
  func.func @transform_4(%arg0: i32) -> (i32, i32) {
    %c0_i32 = arith.constant 0 : i32
    %c0_i32_0 = arith.constant 0 : i32
    %c0_i32_1 = arith.constant 0 : i32
    return %c0_i32, %c0_i32_0 : i32, i32
  }
  func.func @transform_5(%arg0: i32) -> (i32, i32) {
    %c0_i32 = arith.constant 0 : i32
    %c0_i32_0 = arith.constant 0 : i32
    %c0_i32_1 = arith.constant 0 : i32
    return %c0_i32, %c0_i32_0 : i32, i32
  }
  func.func @transform_6(%arg0: i32) -> (i32, i32) {
    %c0_i32 = arith.constant 0 : i32
    %c0_i32_0 = arith.constant 0 : i32
    %c0_i32_1 = arith.constant 0 : i32
    return %c0_i32, %c0_i32_0 : i32, i32
  }
}

</mosaic_0001>

<bundles_post_ra>
// kernel: conv_layer_forward.1
= control target key start
LH: loop header
LB: loop body
LE: loop exit
PB: predicated region body
PF: predicated region fallthrough
CT: control target
= control target key end

     0   :  { %v904_v1 = vmov 0   ;;  %vm314_vm0 = vcmask 130048   ;;  %s1152_s1 = inlined_call_operand.vmem [shape: bf16[128,256], index: 1, kind: input, shape index: {}]   ;;  %s1153_s0 = inlined_call_operand.vmem [shape: bf16[32,128], index: 0, kind: input, shape index: {}]   ;;  %s1154_s2 = inlined_call_operand.vmem [shape: f32[256,16], index: 2, kind: input, shape index: {}]   ;;  %s1155_s3 = inlined_call_operand.vmem [shape: f32[16,256], index: 3, kind: input, shape index: {}]   ;;  %s1156_s4 = inlined_call_operand.vmem [shape: f32[1,16], index: 4, kind: input, shape index: {}]   ;;  %s1157_s5 = inlined_call_operand.vmem [shape: f32[1,16], index: 5, kind: input, shape index: {}]   ;;  %s1158_s6 = inlined_call_operand.vmem [shape: f32[32,256], index: 6, kind: output, shape index: {}]  }
   0x1   :  { %v876_v0 = vld [vmem:[%s1152_s1 + $0x4] ss:$8 sps:$4 sm:$0xff]   ;;  %168 = vmatprep.mubr.bf16.mxu0 %v904_v1  ;;  %v878_v2 = vld [vmem:[%s1152_s1] ss:$8 sps:$4 sm:$0xff]   ;;  %v879_v3 = vld [vmem:[%s1152_s1 + $0x14] ss:$8 sps:$4 sm:$0xff]  }
   0x2   :  { %136 = vmatprep.subr.bf16.mxu0 %v876_v0  ;;  %v881_v4 = vld [vmem:[%s1152_s1 + $0x10] ss:$8 sps:$4 sm:$0xff]   ;;  %v882_v5 = vld [vmem:[%s1152_s1 + $0x24] ss:$8 sps:$4 sm:$0xff]   ;;  %v884_v6 = vld [vmem:[%s1152_s1 + $0x20] ss:$8 sps:$4 sm:$0xff]  }
   0x3   :  { %137 = vmatpush1.bf16.msra.mxu0 %v878_v2  ;;  %v885_v7 = vld [vmem:[%s1152_s1 + $0x34] ss:$8 sps:$4 sm:$0xff]   ;;  %v887_v8 = vld [vmem:[%s1152_s1 + $0x30] ss:$8 sps:$4 sm:$0xff]   ;;  %v888_v9 = vld [vmem:[%s1152_s1 + $0x44] ss:$8 sps:$4 sm:$0xff]  }
   0x4   :  { %138 = vmatprep.subr.bf16.mxu0 %v879_v3  ;;  %v223_v10 = vld [vmem:[%s1154_s2 + $0x80] sm:$0xff]  ;;  %v224_v11 = vld [vmem:[%s1154_s2 + $0x88] sm:$0xff]  ;;  %v225_v16 = vld [vmem:[%s1154_s2 + $0x90] sm:$0xff] }
   0x5   :  { %v207_v12 = vld [vmem:[%s1154_s2] sm:$0xff]  ;;  %v208_v13 = vld [vmem:[%s1154_s2 + $0x8] sm:$0xff]  ;;  %v798_v14 = vpack.c.bf16 %v224_v11, %v223_v10  ;;  %v226_v17 = vld [vmem:[%s1154_s2 + $0x98] sm:$0xff] }
   0x6   :  { %v800_v15 = vpack.c.bf16 %v208_v13, %v207_v12  ;;  %v890_v18 = vld [vmem:[%s1152_s1 + $0x40] ss:$8 sps:$4 sm:$0xff]   ;;  %v802_v19 = vpack.c.bf16 %v226_v17, %v225_v16  ;;  %v891_v20 = vld [vmem:[%s1152_s1 + $0x54] ss:$8 sps:$4 sm:$0xff]   ;;  %v893_v21 = vld [vmem:[%s1152_s1 + $0x50] ss:$8 sps:$4 sm:$0xff]  }
   0x7   :  { %139 = vmatpush1.bf16.msra.mxu0 %v881_v4  ;;  %799 = vmatprep.subr.bf16.mxu1 %v798_v14  ;;  %v894_v22 = vld [vmem:[%s1152_s1 + $0x64] ss:$8 sps:$4 sm:$0xff]   ;;  %v896_v23 = vld [vmem:[%s1152_s1 + $0x60] ss:$8 sps:$4 sm:$0xff]   ;;  %v897_v24 = vld [vmem:[%s1152_s1 + $0x74] ss:$8 sps:$4 sm:$0xff]  }
   0x8   :  { %140 = vmatprep.subr.bf16.mxu0 %v882_v5  ;;  %801 = vmatpush3.bf16.msra.mxu1 %v800_v15  ;;  %v899_v25 = vld [vmem:[%s1152_s1 + $0x70] ss:$8 sps:$4 sm:$0xff]   ;;  %v900_v26 = vld [vmem:[%s1153_s0] sm:$0xff]   ;;  %v901_v27 = vld [vmem:[%s1153_s0 + $0x8] sm:$0xff]  }
   0x9   :  { %803 = vmatprep.subr.bf16.mxu1 %v802_v19  ;;  %v209_v28 = vld [vmem:[%s1154_s2 + $0x10] sm:$0xff]  ;;  %v210_v29 = vld [vmem:[%s1154_s2 + $0x18] sm:$0xff]  ;;  %v227_v31 = vld [vmem:[%s1154_s2 + $0xa0] sm:$0xff] }
   0xa   :  { %v804_v30 = vpack.c.bf16 %v210_v29, %v209_v28  ;;  %v228_v32 = vld [vmem:[%s1154_s2 + $0xa8] sm:$0xff]  ;;  %v211_v34 = vld [vmem:[%s1154_s2 + $0x20] sm:$0xff]  ;;  %v229_v37 = vld [vmem:[%s1154_s2 + $0xb0] sm:$0xff] }
   0xb   :  { %141 = vmatpush1.bf16.msra.mxu0 %v884_v6  ;;  %v806_v33 = vpack.c.bf16 %v228_v32, %v227_v31  ;;  %v212_v35 = vld [vmem:[%s1154_s2 + $0x28] sm:$0xff]  ;;  %v230_v38 = vld [vmem:[%s1154_s2 + $0xb8] sm:$0xff]  ;;  %v213_v40 = vld [vmem:[%s1154_s2 + $0x30] sm:$0xff] }
   0xc   :  { %142 = vmatprep.subr.bf16.mxu0 %v885_v7  ;;  %805 = vmatpush3.bf16.msra.mxu1 %v804_v30  ;;  %v808_v36 = vpack.c.bf16 %v212_v35, %v211_v34  ;;  %v810_v39 = vpack.c.bf16 %v230_v38, %v229_v37  ;;  %v214_v41 = vld [vmem:[%s1154_s2 + $0x38] sm:$0xff]  ;;  %v231_v43 = vld [vmem:[%s1154_s2 + $0xc0] sm:$0xff]  ;;  %v232_v44 = vld [vmem:[%s1154_s2 + $0xc8] sm:$0xff]  ;;  %v905_v35 = vmov 0.0  }
   0xd   :  { %807 = vmatprep.subr.bf16.mxu1 %v806_v33  ;;  %v812_v42 = vpack.c.bf16 %v214_v41, %v213_v40  ;;  %v814_v45 = vpack.c.bf16 %v232_v44, %v231_v43  ;;  %v215_v46 = vld [vmem:[%s1154_s2 + $0x40] sm:$0xff]  ;;  %v216_v47 = vld [vmem:[%s1154_s2 + $0x48] sm:$0xff]  ;;  %v233_v49 = vld [vmem:[%s1154_s2 + $0xd0] sm:$0xff]  ;;  %v389_v40 = vlaneseq }
   0xe   :  { %v816_v48 = vpack.c.bf16 %v216_v47, %v215_v46  ;;  %v234_v50 = vld [vmem:[%s1154_s2 + $0xd8] sm:$0xff]  ;;  %v217_v52 = vld [vmem:[%s1154_s2 + $0x50] sm:$0xff]  ;;  %v235_v55 = vld [vmem:[%s1154_s2 + $0xe0] sm:$0xff] }
   0xf   :  { %143 = vmatpush1.bf16.msra.mxu0 %v887_v8  ;;  %v818_v51 = vpack.c.bf16 %v234_v50, %v233_v49  ;;  %v218_v53 = vld [vmem:[%s1154_s2 + $0x58] sm:$0xff]  ;;  %v236_v56 = vld [vmem:[%s1154_s2 + $0xe8] sm:$0xff]  ;;  %v219_v58 = vld [vmem:[%s1154_s2 + $0x60] sm:$0xff]  ;;  %v390_v41 = vshrl.u32 %v389_v40, 7 }
  0x10   :  { %144 = vmatprep.subr.bf16.mxu0 %v888_v9  ;;  %809 = vmatpush3.bf16.msra.mxu1 %v808_v36  ;;  %v820_v54 = vpack.c.bf16 %v218_v53, %v217_v52  ;;  %v822_v57 = vpack.c.bf16 %v236_v56, %v235_v55  ;;  %v220_v59 = vld [vmem:[%s1154_s2 + $0x68] sm:$0xff]  ;;  %v237_v61 = vld [vmem:[%s1154_s2 + $0xf0] sm:$0xff]  ;;  %v238_v62 = vld [vmem:[%s1154_s2 + $0xf8] sm:$0xff] }
  0x11   :  { %811 = vmatprep.subr.bf16.mxu1 %v810_v39  ;;  %v824_v60 = vpack.c.bf16 %v220_v59, %v219_v58  ;;  %v221_v63 = vld [vmem:[%s1154_s2 + $0x70] sm:$0xff]  ;;  %v826_v0 = vpack.c.bf16 %v238_v62, %v237_v61  ;;  %v311_v29 = vld [vmem:[%s1155_s3 + $0x8] sm:$0xff]  ;;  %v310_v32 = vld [vmem:[%s1155_s3] sm:$0xff] }
  0x13   :  { %145 = vmatpush1.bf16.msra.mxu0 %v890_v18 }
  0x14   :  { %146 = vmatprep.subr.bf16.mxu0 %v891_v20  ;;  %813 = vmatpush3.bf16.msra.mxu1 %v812_v42 }
  0x15   :  { %815 = vmatprep.subr.bf16.mxu1 %v814_v45 }
  0x17   :  { %147 = vmatpush1.bf16.msra.mxu0 %v893_v21 }
  0x18   :  { %148 = vmatprep.subr.bf16.mxu0 %v894_v22  ;;  %817 = vmatpush3.bf16.msra.mxu1 %v816_v48 }
  0x19   :  { %819 = vmatprep.subr.bf16.mxu1 %v818_v51 }
  0x1b   :  { %149 = vmatpush1.bf16.msra.mxu0 %v896_v23 }
  0x1c   :  { %150 = vmatprep.subr.bf16.mxu0 %v897_v24  ;;  %821 = vmatpush3.bf16.msra.mxu1 %v820_v54 }
  0x1d   :  { %823 = vmatprep.subr.bf16.mxu1 %v822_v57 }
  0x1f   :  { %151 = vmatpush1.bf16.msra.mxu0 %v899_v25 }
  0x20   :  { %835 = vmatprep.subr.bf16.mxu0 %v798_v14  ;;  %825 = vmatpush3.bf16.msra.mxu1 %v824_v60 }
  0x21   :  { %827 = vmatprep.subr.bf16.mxu1 %v826_v0 }
  0x22   :  { %169 = vmatmul.mubr.bf16.vlgmr.msra.gmra.mrb[0].mxu0 %v900_v26 }
  0x23   :  { %178 = vmatprep.mubr.bf16.mxu0 %v904_v1  ;;  %837 = vmatpush3.bf16.msra.mxu0 %v800_v15  ;;  %v222_v1 = vld [vmem:[%s1154_s2 + $0x78] sm:$0xff] }
  0x24   :  { %839 = vmatprep.subr.bf16.mxu0 %v802_v19  ;;  %v828_v2 = vpack.c.bf16 %v222_v1, %v221_v63 }
  0x26   :  { %829 = vmatpush3.bf16.msra.mxu1 %v828_v2 }
  0x27   :  { %841 = vmatpush3.bf16.msra.mxu0 %v804_v30  ;;  %v313_v30 = vld [vmem:[%s1155_s3 + $0x18] sm:$0xff] }
  0x28   :  { %843 = vmatprep.subr.bf16.mxu0 %v806_v33  ;;  %v830_v31 = vpack.c.bf16 %v313_v30, %v311_v29  ;;  %v312_v33 = vld [vmem:[%s1155_s3 + $0x10] sm:$0xff] }
  0x29   :  { %v1103_v34 = vpack.c.bf16 %v312_v33, %v310_v32 }
  0x2a   :  { %179 = vmatmul.mubr.bf16.gmra.mrb[4].mxu0 %v901_v27  ;;  %831 = vmatprep.subr.bf16.mxu1 %v830_v31 }
  0x2b   :  { %845 = vmatpush3.bf16.msra.mxu0 %v808_v36 }
  0x2c   :  { %847 = vmatprep.subr.bf16.mxu0 %v810_v39 }
  0x2f   :  { %849 = vmatpush3.bf16.msra.mxu0 %v812_v42  ;;  %v1110_v42 = vsub.s32 0, %v390_v41 }
  0x30   :  { %851 = vmatprep.subr.bf16.mxu0 %v814_v45 }
  0x33   :  { %853 = vmatpush3.bf16.msra.mxu0 %v816_v48 }
  0x34   :  { %855 = vmatprep.subr.bf16.mxu0 %v818_v51 }
  0x37   :  { %857 = vmatpush3.bf16.msra.mxu0 %v820_v54 }
  0x38   :  { %859 = vmatprep.subr.bf16.mxu0 %v822_v57 }
  0x3b   :  { %861 = vmatpush3.bf16.msra.mxu0 %v824_v60 }
  0x3c   :  { %863 = vmatprep.subr.bf16.mxu0 %v826_v0 }
  0x3f   :  { %865 = vmatpush3.bf16.msra.mxu0 %v828_v2 }
  0xf5   :  { %v170_v3 = vpop.f32.mrb[0].mxu0 }
  0xf6   :  { %v172_v4 = vpop.f32.mrb[1].mxu0 }
  0xf7   :  { %v174_v5 = vpop.f32.mrb[2].mxu0 }
  0xf8   :  { %v189_v6 = vadd.f32 %v174_v5, %v170_v3  ;;  %v176_v7 = vpop.f32.mrb[3].mxu0 }
  0xf9   :  { %v198_v8 = vadd.f32 %v176_v7, %v172_v4 }
  0xfd   :  { %v180_v9 = vpop.f32.mrb[4].mxu0 }
  0xfe   :  { %v190_v10 = vadd.f32 %v189_v6, %v180_v9  ;;  %v182_v11 = vpop.f32.mrb[5].mxu0 }
  0xff   :  { %v199_v12 = vadd.f32 %v198_v8, %v182_v11  ;;  %v184_v13 = vpop.f32.mrb[6].mxu0 }
 0x100   :  { %v191_v14 = vadd.f32 %v190_v10, %v184_v13  ;;  %v186_v15 = vpop.f32.mrb[7].mxu0 }
 0x101   :  { %v200_v16 = vadd.f32 %v199_v12, %v186_v15 }
 0x102   :  { %v192_v17 = vrot.slane %v191_v14, 4 }
 0x103   :  { %v201_v18 = vrot.slane %v200_v16, 4 }
 0x104   :  { %v193_v19 = vadd.f32 %v192_v17, %v191_v14 }
 0x105   :  { %v202_v20 = vadd.f32 %v201_v18, %v200_v16 }
 0x106   :  { %v194_v21 = vrot.slane %v193_v19, 2 }
 0x107   :  { %v203_v22 = vrot.slane %v202_v20, 2 }
 0x108   :  { %v195_v23 = vadd.f32 %v194_v21, %v193_v19 }
 0x109   :  { %v204_v24 = vadd.f32 %v203_v22, %v202_v20  ;;  %v504_v22 = vld [vmem:[%s1156_s4] sm:$0x1] }
 0x10a   :  { %v196_v25 = vrot.slane %v195_v23, 1 }
 0x10b   :  { %v205_v26 = vrot.slane %v204_v24, 1 }
 0x10c   :  { %v197_v28 = vadd.f32 %v196_v25, %v195_v23  ;;  %v580_v25 = vld [vmem:[%s1157_s5] sm:$0x1] }
 0x10d   :  { %v206_v27 = vadd.f32 %v205_v26, %v204_v24 }
 0x10f   :  { %303 = vmatprep.mubr.f32.mxu1 %v206_v27 }
 0x110   :  { %304 = vmatmul.mubr.f32.vlgmr.msra.gmra.mrb[0].mxu1 %v197_v28 }
 0x111   :  { %833 = vmatpush1.bf16.msra.mxu1 %v1103_v34  ;;  %382 = vmatprep.mubr.f32.mxu1 %v905_v35 }
 0x112   :  { %867 = vmatprep.subr.bf16.mxu1 %v830_v31 }
 0x1e3   :  { %v760_v36 = vpop.f32.mrb[0].mxu1 }
 0x1e4   :  { %v761_v37 = vpop.f32.mrb[1].mxu1 }
 0x1e5   :  { %v762_v38 = vadd.f32 %v761_v37, %v760_v36 }
 0x1e7   :  { %v309_v39 = vmul.f32 0.001953125, %v762_v38 }
 0x1e9   :  { %725 = vmatmul.mubr.msk.f32.vlgmr.msra.gmra.mrb[2].mxu1 %vm314_vm0, %v309_v39 }
 0x1ea   :  { %869 = vmatpush1.bf16.msra.mxu1 %v1103_v34  ;;  %573 = vmatprep.mubr.f32.mxu1 %v905_v35 }
 0x1eb   :  { %871 = vmatprep.subr.bf16.mxu1 %v830_v31 }
 0x2bc   :  { %v384_v43 = vpop.f32.mrb[2].mxu1 }
 0x2bd   :  { %v392_v44 = vrot.slane %v384_v43, %v1110_v42  ;;  %v386_v45 = vpop.f32.mrb[3].mxu1 }
 0x2be   :  { %v396_v46 = vrot.slane %v386_v45, %v1110_v42 }
 0x2bf   :  { %v397_v47 = vsub.f32 %v170_v3, %v392_v44  ;;  %v399_v48 = vsub.f32 %v174_v5, %v392_v44  ;;  %v401_v49 = vsub.f32 %v180_v9, %v392_v44  ;;  %v403_v50 = vsub.f32 %v184_v13, %v392_v44 }
 0x2c0   :  { %v398_v51 = vsub.f32 %v172_v4, %v396_v46  ;;  %v400_v52 = vsub.f32 %v176_v7, %v396_v46  ;;  %v402_v53 = vsub.f32 %v182_v11, %v396_v46  ;;  %v404_v54 = vsub.f32 %v186_v15, %v396_v46 }
 0x2c1   :  { %v405_v55 = vmul.f32 %v397_v47, %v397_v47  ;;  %v407_v56 = vmul.f32 %v399_v48, %v399_v48  ;;  %v409_v59 = vmul.f32 %v401_v49, %v401_v49  ;;  %v411_v63 = vmul.f32 %v403_v50, %v403_v50 }
 0x2c2   :  { %v406_v57 = vmul.f32 %v398_v51, %v398_v51  ;;  %v408_v58 = vmul.f32 %v400_v52, %v400_v52  ;;  %v410_v61 = vmul.f32 %v402_v53, %v402_v53  ;;  %v412_v1 = vmul.f32 %v404_v54, %v404_v54 }
 0x2c3   :  { %v413_v60 = vadd.f32 %v407_v56, %v405_v55 }
 0x2c4   :  { %v422_v62 = vadd.f32 %v408_v58, %v406_v57 }
 0x2c5   :  { %v414_v0 = vadd.f32 %v413_v60, %v409_v59 }
 0x2c6   :  { %v423_v2 = vadd.f32 %v422_v62, %v410_v61 }
 0x2c7   :  { %v415_v3 = vadd.f32 %v414_v0, %v411_v63 }
 0x2c8   :  { %v424_v5 = vadd.f32 %v423_v2, %v412_v1 }
 0x2c9   :  { %v416_v6 = vrot.slane %v415_v3, 4 }
 0x2ca   :  { %v425_v8 = vrot.slane %v424_v5, 4 }
 0x2cb   :  { %v417_v4 = vadd.f32 %v416_v6, %v415_v3 }
 0x2cc   :  { %v426_v7 = vadd.f32 %v425_v8, %v424_v5 }
 0x2cd   :  { %v418_v9 = vrot.slane %v417_v4, 2 }
 0x2ce   :  { %v427_v10 = vrot.slane %v426_v7, 2 }
 0x2cf   :  { %v419_v11 = vadd.f32 %v418_v9, %v417_v4 }
 0x2d0   :  { %v428_v12 = vadd.f32 %v427_v10, %v426_v7 }
 0x2d1   :  { %v420_v13 = vrot.slane %v419_v11, 1 }
 0x2d2   :  { %v429_v14 = vrot.slane %v428_v12, 1 }
 0x2d3   :  { %v421_v16 = vadd.f32 %v420_v13, %v419_v11 }
 0x2d4   :  { %v430_v15 = vadd.f32 %v429_v14, %v428_v12 }
 0x2d6   :  { %495 = vmatprep.mubr.f32.mxu0 %v430_v15 }
 0x2d7   :  { %496 = vmatmul.mubr.f32.vlgmr.msra.gmra.mrb[8].mxu0 %v421_v16 }
 0x3aa   :  { %v795_v17 = vpop.f32.mrb[8].mxu0 }
 0x3ab   :  { %v796_v18 = vpop.f32.mrb[9].mxu0 }
 0x3ac   :  { %v797_v19 = vadd.f32 %v796_v18, %v795_v17 }
 0x3ae   :  { %v501_v20 = vmul.f32 0.001953125, %v797_v19 }
 0x3b0   :  { %v502_v21 = vadd.f32 1e-05, %v501_v20 }
 0x3b2   :  { %902 = vrsqrt.f32 %v502_v21 }
 0x3bc   :  { %v903_v23 = vpop.eup %902 }
 0x3bd   :  { %v505_v24 = vmul.f32 %v903_v23, %v504_v22 }
 0x3bf   :  { %726 = vmatmul.mubr.msk.f32.vlgmr.msra.gmra.mrb[4].mxu1 %vm314_vm0, %v505_v24 }
 0x3c0   :  { %873 = vmatpush1.bf16.msra.mxu1 %v1103_v34  ;;  %648 = vmatprep.mubr.f32.mxu1 %v905_v35 }
 0x3c3   :  { %727 = vmatmul.mubr.msk.f32.vlgmr.msra.gmra.mrb[6].mxu1 %vm314_vm0, %v580_v25 }
 0x492   :  { %v575_v26 = vpop.f32.mrb[4].mxu1 }
 0x493   :  { %v658_v27 = vrot.slane %v575_v26, %v1110_v42  ;;  %v577_v28 = vpop.f32.mrb[5].mxu1 }
 0x494   :  { %v662_v29 = vrot.slane %v577_v28, %v1110_v42 }
 0x495   :  { %v663_v30 = vmul.f32 %v658_v27, %v397_v47  ;;  %v665_v31 = vmul.f32 %v658_v27, %v399_v48  ;;  %v667_v33 = vmul.f32 %v658_v27, %v401_v49  ;;  %v669_v36 = vmul.f32 %v658_v27, %v403_v50 }
 0x496   :  { %v650_v32 = vpop.f32.mrb[6].mxu1  ;;  %v664_v34 = vmul.f32 %v662_v29, %v398_v51  ;;  %v666_v38 = vmul.f32 %v662_v29, %v400_v52  ;;  %v668_v39 = vmul.f32 %v662_v29, %v402_v53  ;;  %v670_v40 = vmul.f32 %v662_v29, %v404_v54 }
 0x497   :  { %v674_v35 = vrot.slane %v650_v32, %v1110_v42  ;;  %v652_v37 = vpop.f32.mrb[7].mxu1 }
 0x498   :  { %v678_v41 = vrot.slane %v652_v37, %v1110_v42 }
 0x499   :  { %v679_v43 = vadd.f32 %v674_v35, %v663_v30  ;;  %v681_v44 = vadd.f32 %v674_v35, %v665_v31  ;;  %v683_v45 = vadd.f32 %v674_v35, %v667_v33  ;;  %v685_v46 = vadd.f32 %v674_v35, %v669_v36 }
 0x49a   :  { %v680_v55 = vadd.f32 %v678_v41, %v664_v34  ;;  %v682_v56 = vadd.f32 %v678_v41, %v666_v38  ;;  %v684_v47 = vadd.f32 %v678_v41, %v668_v39  ;;  %v686_v48 = vadd.f32 %v678_v41, %v670_v40 }
 0x49b   :  { %v687_v57 = vmax.f32 %v679_v43, 0.0  ;;  %v689_v49 = vmax.f32 %v681_v44, 0.0  ;;  %v691_v50 = vmax.f32 %v683_v45, 0.0  ;;  %v693_v51 = vmax.f32 %v685_v46, 0.0 }
 0x49c   :  { %v688_v58 = vmax.f32 %v680_v55, 0.0  ;;  %v690_v59 = vmax.f32 %v682_v56, 0.0  ;;  %v692_v60 = vmax.f32 %v684_v47, 0.0  ;;  %v694_v52 = vmax.f32 %v686_v48, 0.0 }
 0x49d   :  { %695 = vst [vmem:[%s1158_s6] sm:$0xff] %v687_v57  ;;  %697 = vst [vmem:[%s1158_s6 + $0x10] sm:$0xff] %v689_v49 }
 0x49e   :  { %699 = vst [vmem:[%s1158_s6 + $0x20] sm:$0xff] %v691_v50  ;;  %701 = vst [vmem:[%s1158_s6 + $0x30] sm:$0xff] %v693_v51 }
 0x49f   :  { %696 = vst [vmem:[%s1158_s6 + $0x8] sm:$0xff] %v688_v58  ;;  %698 = vst [vmem:[%s1158_s6 + $0x18] sm:$0xff] %v690_v59 }
 0x4a0   :  { %700 = vst [vmem:[%s1158_s6 + $0x28] sm:$0xff] %v692_v60  ;;  %702 = vst [vmem:[%s1158_s6 + $0x38] sm:$0xff] %v694_v52 }

</bundles_post_ra>
